<compile_context>
chip_gen: v6e
topology: v6e:2x2x1
jax: 0.10.0
libtpu: 0.0.40
codegen_flags: <defaults>
</compile_context>

<pallas_src>
import functools

import jax
import jax.numpy as jnp
import numpy as np
from jax import lax
from jax.experimental import pallas as pl
from jax.experimental.pallas import tpu as pltpu


# ----------------------------------------------------------------------------
# Pallas kernel
# ----------------------------------------------------------------------------
def _channel_att_kernel(x_ref, y_ref, alpha_ref,
                        wd_ref, bd_ref, wu_ref, bu_ref,
                        out_ref, acc_ref,
                        *, hw_total, t_hw, chunk, needs_mask):
    k = pl.program_id(1)                       # spatial-tile index
    k_last = pl.num_programs(1) - 1

    # ---- init accumulator on the first spatial tile of each batch block ----
    @pl.when(k == 0)
    def _():
        acc_ref[...] = jnp.zeros_like(acc_ref)

    n_full = t_hw // chunk
    rem = t_hw - n_full * chunk

    def fold(masked):
        # Fold this spatial tile into the (B_blk, C, chunk) accumulator with
        # lane-aligned slice-adds (pure VPU, no cross-lane traffic).  Refs are
        # sliced per chunk so no full-tile f32 temp is ever materialized.
        def add_piece(lo, size):
            xs = x_ref[:, :, lo:lo + size].astype(jnp.float32)
            ys = y_ref[:, :, lo:lo + size].astype(jnp.float32)
            piece = xs + ys
            if masked:
                lane = lax.broadcasted_iota(jnp.int32, piece.shape, 2)
                valid = (k * t_hw + lo + lane) < hw_total
                piece = jnp.where(valid, piece, 0.0)
            acc_ref[:, :, 0:size] += piece

        for j in range(n_full):
            add_piece(j * chunk, chunk)
        if rem:
            add_piece(n_full * chunk, rem)

    if needs_mask:
        # Only the last (ragged) tile pays for the iota/compare/select.
        @pl.when(k < k_last)
        def _():
            fold(False)

        @pl.when(k == k_last)
        def _():
            fold(True)
    else:
        fold(False)

    # ---- epilogue: pool-finalize + 1x1 convs + PReLU + sigmoid --------------
    @pl.when(k == k_last)
    def _():
        # AdaptiveAvgPool2d(1): one small cross-lane reduce + scale by 1/HW.
        pooled = jnp.sum(acc_ref[...], axis=2) * (1.0 / hw_total)      # (B_blk, C)

        # channel_down: 1x1 conv (C -> C//r) + PReLU (single shared alpha).
        z = jnp.dot(pooled, wd_ref[...],
                    preferred_element_type=jnp.float32) + bd_ref[...]
        alpha = alpha_ref[0]                                           # SMEM scalar
        z = jnp.where(z >= 0.0, z, alpha * z)

        # fused channel_up1 | channel_up2: one (Cr, 2C) matmul + sigmoid.
        o = jnp.dot(z, wu_ref[...],
                    preferred_element_type=jnp.float32) + bu_ref[...]  # (B_blk, 2C)
        out_ref[0] = jax.nn.sigmoid(o)


# ----------------------------------------------------------------------------
# Sizing helpers
# ----------------------------------------------------------------------------
def _vmem_capacity_bytes():
    """Physical per-core VMEM; conservative 64 MiB fallback (v7x size)."""
    try:
        cap = getattr(pltpu.get_tpu_info(), "vmem_capacity_bytes", None)
        if cap:
            return int(cap)
    except Exception:
        pass
    return 64 * 1024 * 1024


def _choose_spatial_tile(hw, b_blk, c, itemsize, per_block_budget):
    """Lane-tile size for the HW axis: as large as the per-block byte budget
    allows (multiple of 128), or the full HW extent if it fits."""
    per_lane_bytes = max(1, b_blk * c * itemsize)
    t = per_block_budget // per_lane_bytes
    if hw <= 128 or t >= hw:
        return hw                               # block == full dim is always legal
    return max(128, (t // 128) * 128)


def _choose_acc_chunk(t_hw):
    """Accumulator lane width: 128-lane granules, capping the per-tile static
    fold unroll at 8 slice-adds."""
    if t_hw <= 128:
        return t_hw
    return 128 * pl.cdiv(t_hw // 128, 8)


# ----------------------------------------------------------------------------
# Wrapper
# ----------------------------------------------------------------------------
def channel_att_pallas(x_nchw, y_nchw, params, *, tile_cap=None):
    """x_nchw, y_nchw: (B, C, H, W). Returns [out_x, out_y] each (B, C, 1, 1) f32.

    tile_cap (testing hook): optional multiple-of-128 upper bound on the
    spatial lane-tile, used to force the multi-tile / ragged-mask code paths.
    """
    assert x_nchw.shape == y_nchw.shape
    B, C, H, W = y_nchw.shape
    HW = H * W
    Cr = params["wd_t"].shape[1]

    # Stream in native dtype (bf16 halves the HBM-bound byte count); the
    # kernel upcasts per chunk, the accumulator stays f32.
    x3 = x_nchw.reshape(B, C, HW)
    y3 = y_nchw.reshape(B, C, HW)
    itemsize = max(x3.dtype.itemsize, y3.dtype.itemsize)

    # Fused up-projection weights (precomputed once in init_params).
    wu = params.get("wu_fused")
    bu = params.get("bu_fused")
    if wu is None:
        wu = jnp.concatenate([params["wu1_t"], params["wu2_t"]], axis=1)   # (Cr, 2C)
        bu = jnp.concatenate([params["bu1"], params["bu2"]], axis=1)       # (1, 2C)

    # Batch-parallel leading grid axis: shards across v7x's two TensorCores,
    # neutral on single-core v5e/v6e (same bytes, a few extra ~0.35us steps).
    if B >= 2 and B % 2 == 0:
        n_b, b_blk = 2, B // 2
    else:
        n_b, b_blk = 1, B

    # Generation-aware per-block budget: 2 inputs x 2 buffers x budget stays
    # around 40% of physical VMEM (128 MiB on v5e/v6e, 64 MiB on v7x).
    vmem_cap = _vmem_capacity_bytes()
    per_block_budget = vmem_cap // 10

    t_hw = _choose_spatial_tile(HW, b_blk, C, itemsize, per_block_budget)
    if tile_cap is not None and tile_cap < t_hw:
        assert tile_cap % 128 == 0
        t_hw = tile_cap
    chunk = _choose_acc_chunk(t_hw)
    n_tiles = pl.cdiv(HW, t_hw)
    needs_mask = (HW % t_hw) != 0

    # Explicit scoped-VMEM limit (v5e's 16 MiB default is too small once the
    # blocks are enlarged); clamp to 90% of physical VMEM.
    x_block = b_blk * C * t_hw * x3.dtype.itemsize
    y_block = b_blk * C * t_hw * y3.dtype.itemsize
    acc_bytes = b_blk * C * chunk * 4
    w_bytes = (C * Cr + Cr + Cr * 2 * C + 2 * C) * 4
    out_bytes = b_blk * 2 * C * 4
    needed = 2 * (x_block + y_block) + acc_bytes + 2 * (w_bytes + out_bytes) + (2 << 20)
    vmem_limit = int(min(vmem_cap * 9 // 10, max(needed, 16 << 20)))

    kernel = functools.partial(_channel_att_kernel,
                               hw_total=HW, t_hw=t_hw, chunk=chunk,
                               needs_mask=needs_mask)

    grid_spec = pltpu.PrefetchScalarGridSpec(
        num_scalar_prefetch=0,
        grid=(n_b, n_tiles),
        in_specs=[
            pl.BlockSpec((b_blk, C, t_hw), lambda b, k: (b, 0, k)),      # x
            pl.BlockSpec((b_blk, C, t_hw), lambda b, k: (b, 0, k)),      # y
            pl.BlockSpec(memory_space=pltpu.MemorySpace.SMEM),           # PReLU alpha
            pl.BlockSpec((C, Cr), lambda b, k: (0, 0)),                  # W_down^T
            pl.BlockSpec((1, Cr), lambda b, k: (0, 0)),                  # b_down
            pl.BlockSpec((Cr, 2 * C), lambda b, k: (0, 0)),              # fused W_up^T
            pl.BlockSpec((1, 2 * C), lambda b, k: (0, 0)),               # fused b_up
        ],
        out_specs=pl.BlockSpec((1, b_blk, 2 * C), lambda b, k: (b, 0, 0)),
        scratch_shapes=[pltpu.VMEM((b_blk, C, chunk), jnp.float32)],     # pooled-sum acc
    )

    # Advisory cost hint: bandwidth-heavy (streams x and y once).
    bytes_accessed = (B * C * HW) * (x3.dtype.itemsize + y3.dtype.itemsize) \
        + w_bytes + B * 2 * C * 4
    flops = 2 * B * C * HW + 2 * B * C * Cr + 2 * B * Cr * 2 * C
    cost = pl.CostEstimate(flops=flops,
                           transcendentals=B * 2 * C,
                           bytes_accessed=bytes_accessed)

    out = pl.pallas_call(
        kernel,
        out_shape=jax.ShapeDtypeStruct((n_b, b_blk, 2 * C), jnp.float32),
        grid_spec=grid_spec,
        compiler_params=pltpu.CompilerParams(
            dimension_semantics=("parallel", "arbitrary"),   # batch || , HW carries acc
            vmem_limit_bytes=vmem_limit),
        cost_estimate=cost,
    )(x3, y3,
      params["alpha_down"],
      params["wd_t"], params["bd"],
      wu, bu)

    out = out.reshape(B, 2 * C)
    out_x = out[:, :C].reshape(B, C, 1, 1)
    out_y = out[:, C:].reshape(B, C, 1, 1)
    return [out_x, out_y]


# ----------------------------------------------------------------------------
# Plain-JAX glue: ConvTranspose2d(C, C, 3, stride, padding=1, output_padding=1)
# + PReLU (the `self.up` branch, only taken when x is spatially smaller than y)
# TODO(synk): the transposed conv stays as lax.conv_general_dilated glue (a
# shape-conditional pre-processing step), not a Pallas kernel.
# ----------------------------------------------------------------------------
def conv_transpose2d_prelu(x, w, b, alpha, stride):
    # w: (Cin, Cout, kH, kW)   (PyTorch ConvTranspose2d layout)
    k = w.shape[2]
    padding, output_padding = 1, 1
    kern = jnp.transpose(jnp.flip(w, (2, 3)), (1, 0, 2, 3))  # (Cout, Cin, kH, kW)
    pad = k - 1 - padding
    out = lax.conv_general_dilated(
        x, kern,
        window_strides=(1, 1),
        padding=((pad, pad + output_padding), (pad, pad + output_padding)),
        lhs_dilation=(stride, stride),
        dimension_numbers=("NCHW", "OIHW", "NCHW"),
    )
    out = out + b.reshape(1, -1, 1, 1)
    return jnp.where(out >= 0.0, out, alpha * out)


def channel_att_forward(x, y, params, stride, *, tile_cap=None):
    if x.shape[2] < y.shape[2]:
        x = conv_transpose2d_prelu(x, params["w_up_t"], params["b_up_t"],
                                   params["alpha_up"], stride)
    return channel_att_pallas(x, y, params, tile_cap=tile_cap)


# ----------------------------------------------------------------------------
# Deterministic parameter init (shapes from ChannelAtt.__init__)
# ----------------------------------------------------------------------------
def init_params(key, channel, reduction):
    cr = channel // reduction
    ks = jax.random.split(key, 8)

    def u(k, shape, fan_in):
        bound = 1.0 / np.sqrt(fan_in)
        return jax.random.uniform(k, shape, jnp.float32, -bound, bound)

    # channel_down: Conv2d(C, C//r, 1) -> weight (C//r, C); store transposed (C, C//r)
    wd = u(ks[0], (cr, channel), channel)
    bd = u(ks[1], (1, cr), channel)
    # channel_up1 / channel_up2: Conv2d(C//r, C, 1) -> weight (C, C//r); store transposed
    wu1 = u(ks[2], (channel, cr), cr)
    bu1 = u(ks[3], (1, channel), cr)
    wu2 = u(ks[4], (channel, cr), cr)
    bu2 = u(ks[5], (1, channel), cr)
    # up: ConvTranspose2d(C, C, 3) -> weight (C, C, 3, 3)
    w_up_t = u(ks[6], (channel, channel, 3, 3), channel * 9)
    b_up_t = u(ks[7], (channel,), channel * 9)

    params = {
        "wd_t": wd.T, "bd": bd,
        "alpha_down": jnp.full((1,), 0.25, jnp.float32),   # PReLU default init
        "wu1_t": wu1.T, "bu1": bu1,
        "wu2_t": wu2.T, "bu2": bu2,
        "w_up_t": w_up_t, "b_up_t": b_up_t,
        "alpha_up": jnp.float32(0.25),
    }
    # Fused up-projection (computed once, not per forward call).
    params["wu_fused"] = jnp.concatenate([params["wu1_t"], params["wu2_t"]], axis=1)
    params["bu_fused"] = jnp.concatenate([params["bu1"], params["bu2"]], axis=1)
    return params


# ----------------------------------------------------------------------------
# Pure-JAX reference for verification
# ----------------------------------------------------------------------------
def reference_forward(x, y, params):
    fusion = x + y
    pooled = jnp.mean(fusion, axis=(2, 3))                       # (B, C)
    z = pooled @ params["wd_t"] + params["bd"]
    a = params["alpha_down"][0]
    z = jnp.where(z >= 0, z, a * z)
    ox = jax.nn.sigmoid(z @ params["wu1_t"] + params["bu1"])
    oy = jax.nn.sigmoid(z @ params["wu2_t"] + params["bu2"])
    B, C = ox.shape
    return [ox.reshape(B, C, 1, 1), oy.reshape(B, C, 1, 1)]


if __name__ == "__main__":
    B, C = 2, 16                  # args.feature_num = 16
    reduction, stride = 8, 2

    key = jax.random.PRNGKey(0)
    kp, kd = jax.random.split(key)
    params = init_params(kp, C, reduction)

    # Case 1: single spatial tile + batch-parallel grid axis.
    # Case 2: forced multi-tile with a ragged masked last tile (tile_cap hook).
    # Case 3: native bf16 streaming (half the HBM bytes) + in-tile remainder fold.
    cases = [
        (16, 16, jnp.float32, None, 1e-5),
        (36, 36, jnp.float32, 256, 1e-5),
        (36, 36, jnp.bfloat16, None, 1e-2),
    ]
    for (H, W, dt, cap, tol) in cases:
        kx, ky, kd = jax.random.split(kd, 3)
        x = jax.random.normal(kx, (B, C, H, W), jnp.float32).astype(dt)
        y = jax.random.normal(ky, (B, C, H, W), jnp.float32).astype(dt)

        out_x, out_y = channel_att_forward(x, y, params, stride, tile_cap=cap)
        jax.block_until_ready(out_x)
        jax.block_until_ready(out_y)

        ref_x, ref_y = reference_forward(x.astype(jnp.float32),
                                         y.astype(jnp.float32), params)
        assert np.allclose(np.asarray(out_x), np.asarray(ref_x), atol=tol), (H, W, dt)
        assert np.allclose(np.asarray(out_y), np.asarray(ref_y), atol=tol), (H, W, dt)

    print("KERNEL_OK")
</pallas_src>

<mosaic_0001>
module attributes {stable_mosaic.version = 11 : i64} {
  func.func @_channel_att_kernel(%arg0: i32, %arg1: i32, %arg2: memref<1x16x256xf32, #tpu.memory_space<vmem>>, %arg3: memref<1x16x256xf32, #tpu.memory_space<vmem>>, %arg4: memref<1xf32, #tpu.memory_space<smem>>, %arg5: memref<16x2xf32, #tpu.memory_space<vmem>>, %arg6: memref<1x2xf32, #tpu.memory_space<vmem>>, %arg7: memref<2x32xf32, #tpu.memory_space<vmem>>, %arg8: memref<1x32xf32, #tpu.memory_space<vmem>>, %arg9: memref<1x1x32xf32, #tpu.memory_space<vmem>>, %arg10: memref<1x16x128xf32, #tpu.memory_space<vmem>>) attributes {dimension_semantics = [#tpu.dimension_semantics<parallel>, #tpu.dimension_semantics<arbitrary>], iteration_bounds = array<i64: 2, 1>, scalar_prefetch = 0 : i64, scratch_operands = 1 : i64, tpu.core_type = #tpu.core_type<tc>, window_params = [{transform_indices = @transform_0, window_bounds = array<i64: 1, 16, 256>}, {transform_indices = @transform_1, window_bounds = array<i64: 1, 16, 256>}, {transform_indices = @transform_2, window_bounds = array<i64: 1>}, {pipeline_mode = #tpu.pipeline_mode<synchronous>, transform_indices = @transform_3, window_bounds = array<i64: 16, 2>}, {pipeline_mode = #tpu.pipeline_mode<synchronous>, transform_indices = @transform_4, window_bounds = array<i64: 1, 2>}, {pipeline_mode = #tpu.pipeline_mode<synchronous>, transform_indices = @transform_5, window_bounds = array<i64: 2, 32>}, {pipeline_mode = #tpu.pipeline_mode<synchronous>, transform_indices = @transform_6, window_bounds = array<i64: 1, 32>}, {transform_indices = @transform_7, window_bounds = array<i64: 1, 1, 32>}]} {
    %c0_i32 = arith.constant 0 : i32
    %0 = arith.cmpi eq, %arg1, %c0_i32 : i32
    %1 = arith.extui %0 : i1 to i32
    %c0_i32_0 = arith.constant 0 : i32
    %2 = arith.cmpi ne, %1, %c0_i32_0 : i32
    scf.if %2 {
      %cst = arith.constant 0.000000e+00 : f32
      %18 = vector.broadcast %cst : f32 to vector<1x16x128xf32>
      %c0_25 = arith.constant 0 : index
      %c0_26 = arith.constant 0 : index
      %c0_27 = arith.constant 0 : index
      %19 = vector.load %arg10[%c0_25, %c0_26, %c0_27] : memref<1x16x128xf32, #tpu.memory_space<vmem>>, vector<1x16x128xf32>
      tpu.vector_store %arg10[%c0_25, %c0_26, %c0_27], %18 {strides = array<i32>} : memref<1x16x128xf32, #tpu.memory_space<vmem>>, vector<1x16x128xf32>,
    } else {
    }
    %c0 = arith.constant 0 : index
    %c0_1 = arith.constant 0 : index
    %c0_2 = arith.constant 0 : index
    %3 = vector.load %arg2[%c0, %c0_1, %c0_2] : memref<1x16x256xf32, #tpu.memory_space<vmem>>, vector<1x16x128xf32>
    %c0_3 = arith.constant 0 : index
    %c0_4 = arith.constant 0 : index
    %c0_5 = arith.constant 0 : index
    %4 = vector.load %arg3[%c0_3, %c0_4, %c0_5] : memref<1x16x256xf32, #tpu.memory_space<vmem>>, vector<1x16x128xf32>
    %5 = arith.addf %3, %4 : vector<1x16x128xf32>
    %c0_6 = arith.constant 0 : index
    %c0_7 = arith.constant 0 : index
    %c0_8 = arith.constant 0 : index
    %6 = vector.load %arg10[%c0_6, %c0_7, %c0_8] : memref<1x16x128xf32, #tpu.memory_space<vmem>>, vector<1x16x128xf32>
    %7 = arith.addf %6, %5 : vector<1x16x128xf32>
    %c0_9 = arith.constant 0 : index
    %c0_10 = arith.constant 0 : index
    %c0_11 = arith.constant 0 : index
    %8 = vector.load %arg10[%c0_9, %c0_10, %c0_11] : memref<1x16x128xf32, #tpu.memory_space<vmem>>, vector<1x16x128xf32>
    tpu.vector_store %arg10[%c0_9, %c0_10, %c0_11], %7 {strides = array<i32>} : memref<1x16x128xf32, #tpu.memory_space<vmem>>, vector<1x16x128xf32>,
    %c0_12 = arith.constant 0 : index
    %c0_13 = arith.constant 0 : index
    %c128 = arith.constant 128 : index
    %9 = vector.load %arg2[%c0_12, %c0_13, %c128] : memref<1x16x256xf32, #tpu.memory_space<vmem>>, vector<1x16x128xf32>
    %c0_14 = arith.constant 0 : index
    %c0_15 = arith.constant 0 : index
    %c128_16 = arith.constant 128 : index
    %10 = vector.load %arg3[%c0_14, %c0_15, %c128_16] : memref<1x16x256xf32, #tpu.memory_space<vmem>>, vector<1x16x128xf32>
    %11 = arith.addf %9, %10 : vector<1x16x128xf32>
    %c0_17 = arith.constant 0 : index
    %c0_18 = arith.constant 0 : index
    %c0_19 = arith.constant 0 : index
    %12 = vector.load %arg10[%c0_17, %c0_18, %c0_19] : memref<1x16x128xf32, #tpu.memory_space<vmem>>, vector<1x16x128xf32>
    %13 = arith.addf %12, %11 : vector<1x16x128xf32>
    %c0_20 = arith.constant 0 : index
    %c0_21 = arith.constant 0 : index
    %c0_22 = arith.constant 0 : index
    %14 = vector.load %arg10[%c0_20, %c0_21, %c0_22] : memref<1x16x128xf32, #tpu.memory_space<vmem>>, vector<1x16x128xf32>
    tpu.vector_store %arg10[%c0_20, %c0_21, %c0_22], %13 {strides = array<i32>} : memref<1x16x128xf32, #tpu.memory_space<vmem>>, vector<1x16x128xf32>,
    %c0_i32_23 = arith.constant 0 : i32
    %15 = arith.cmpi eq, %arg1, %c0_i32_23 : i32
    %16 = arith.extui %15 : i1 to i32
    %c0_i32_24 = arith.constant 0 : i32
    %17 = arith.cmpi ne, %16, %c0_i32_24 : i32
    scf.if %17 {
      %c0_25 = arith.constant 0 : index
      %c0_26 = arith.constant 0 : index
      %c0_27 = arith.constant 0 : index
      %18 = vector.load %arg10[%c0_25, %c0_26, %c0_27] : memref<1x16x128xf32, #tpu.memory_space<vmem>>, vector<1x16x128xf32>
      %cst = arith.constant dense<0.000000e+00> : vector<1x16xf32>
      %19 = vector.multi_reduction <add>, %18, %cst [2] : vector<1x16x128xf32> to vector<1x16xf32>
      %cst_28 = arith.constant 3.906250e-03 : f32
      %20 = vector.broadcast %cst_28 : f32 to vector<1x16xf32>
      %21 = arith.mulf %19, %20 : vector<1x16xf32>
      %c0_29 = arith.constant 0 : index
      %c0_30 = arith.constant 0 : index
      %22 = vector.load %arg5[%c0_29, %c0_30] : memref<16x2xf32, #tpu.memory_space<vmem>>, vector<16x2xf32>
      %cst_31 = arith.constant dense<0.000000e+00> : vector<1x2xf32>
      %23 = tpu.matmul %21, %22, %cst_31 {dimension_numbers = #tpu.dot_dimension_numbers<[1], [0], [0], [1], [0, 0, 1, 1], [], []>} : vector<1x16xf32>, vector<16x2xf32>, vector<1x2xf32> -> vector<1x2xf32>
      %c0_32 = arith.constant 0 : index
      %c0_33 = arith.constant 0 : index
      %24 = vector.load %arg6[%c0_32, %c0_33] : memref<1x2xf32, #tpu.memory_space<vmem>>, vector<1x2xf32>
      %25 = arith.addf %23, %24 : vector<1x2xf32>
      %c0_34 = arith.constant 0 : index
      %26 = memref.load %arg4[%c0_34] : memref<1xf32, #tpu.memory_space<smem>>
      %cst_35 = arith.constant 0.000000e+00 : f32
      %27 = vector.broadcast %cst_35 : f32 to vector<1x2xf32>
      %28 = arith.cmpf oge, %25, %27 : vector<1x2xf32>
      %29 = vector.broadcast %26 : f32 to vector<1x2xf32>
      %30 = arith.mulf %29, %25 : vector<1x2xf32>
      %31 = arith.select %28, %25, %30 : vector<1x2xi1>, vector<1x2xf32>
      %c0_36 = arith.constant 0 : index
      %c0_37 = arith.constant 0 : index
      %32 = vector.load %arg7[%c0_36, %c0_37] : memref<2x32xf32, #tpu.memory_space<vmem>>, vector<2x32xf32>
      %cst_38 = arith.constant dense<0.000000e+00> : vector<1x32xf32>
      %33 = tpu.matmul %31, %32, %cst_38 {dimension_numbers = #tpu.dot_dimension_numbers<[1], [0], [0], [1], [0, 0, 1, 1], [], []>} : vector<1x2xf32>, vector<2x32xf32>, vector<1x32xf32> -> vector<1x32xf32>
      %c0_39 = arith.constant 0 : index
      %c0_40 = arith.constant 0 : index
      %34 = vector.load %arg8[%c0_39, %c0_40] : memref<1x32xf32, #tpu.memory_space<vmem>>, vector<1x32xf32>
      %35 = arith.addf %33, %34 : vector<1x32xf32>
      %36 = arith.negf %35 : vector<1x32xf32>
      %37 = math.exp %36 : vector<1x32xf32>
      %cst_41 = arith.constant 1.000000e+00 : f32
      %38 = vector.broadcast %cst_41 : f32 to vector<1x32xf32>
      %39 = arith.addf %38, %37 : vector<1x32xf32>
      %40 = arith.divf %38, %39 : vector<1x32xf32>
      %c0_42 = arith.constant 0 : index
      %c0_43 = arith.constant 0 : index
      %c0_44 = arith.constant 0 : index
      %41 = vector.load %arg9[%c0_42, %c0_43, %c0_44] : memref<1x1x32xf32, #tpu.memory_space<vmem>>, vector<1x1x32xf32>
      %42 = vector.shape_cast %41 : vector<1x1x32xf32> to vector<1x32xf32>
      %43 = vector.shape_cast %40 : vector<1x32xf32> to vector<1x1x32xf32>
      tpu.vector_store %arg9[%c0_42, %c0_43, %c0_44], %43 {strides = array<i32>} : memref<1x1x32xf32, #tpu.memory_space<vmem>>, vector<1x1x32xf32>,
    } else {
    }
    return
  }
  func.func @transform_0(%arg0: i32, %arg1: i32) -> (i32, i32, i32) {
    %c0_i32 = arith.constant 0 : i32
    %c0_i32_0 = arith.constant 0 : i32
    return %arg0, %c0_i32, %arg1 : i32, i32, i32
  }
  func.func @transform_1(%arg0: i32, %arg1: i32) -> (i32, i32, i32) {
    %c0_i32 = arith.constant 0 : i32
    %c0_i32_0 = arith.constant 0 : i32
    return %arg0, %c0_i32, %arg1 : i32, i32, i32
  }
  func.func @transform_2(%arg0: i32, %arg1: i32) -> i32 {
    %c0_i32 = arith.constant 0 : i32
    %c0_i32_0 = arith.constant 0 : i32
    return %c0_i32 : i32
  }
  func.func @transform_3(%arg0: i32, %arg1: i32) -> (i32, i32) {
    %c0_i32 = arith.constant 0 : i32
    %c0_i32_0 = arith.constant 0 : i32
    %c0_i32_1 = arith.constant 0 : i32
    return %c0_i32, %c0_i32_0 : i32, i32
  }
  func.func @transform_4(%arg0: i32, %arg1: i32) -> (i32, i32) {
    %c0_i32 = arith.constant 0 : i32
    %c0_i32_0 = arith.constant 0 : i32
    %c0_i32_1 = arith.constant 0 : i32
    return %c0_i32, %c0_i32_0 : i32, i32
  }
  func.func @transform_5(%arg0: i32, %arg1: i32) -> (i32, i32) {
    %c0_i32 = arith.constant 0 : i32
    %c0_i32_0 = arith.constant 0 : i32
    %c0_i32_1 = arith.constant 0 : i32
    return %c0_i32, %c0_i32_0 : i32, i32
  }
  func.func @transform_6(%arg0: i32, %arg1: i32) -> (i32, i32) {
    %c0_i32 = arith.constant 0 : i32
    %c0_i32_0 = arith.constant 0 : i32
    %c0_i32_1 = arith.constant 0 : i32
    return %c0_i32, %c0_i32_0 : i32, i32
  }
  func.func @transform_7(%arg0: i32, %arg1: i32) -> (i32, i32, i32) {
    %c0_i32 = arith.constant 0 : i32
    %c0_i32_0 = arith.constant 0 : i32
    %c0_i32_1 = arith.constant 0 : i32
    return %arg0, %c0_i32, %c0_i32_0 : i32, i32, i32
  }
}

</mosaic_0001>

<bundles_post_ra>
// kernel: tpu_custom_call.1
= control target key start
LH: loop header
LB: loop body
LE: loop exit
PB: predicated region body
PF: predicated region fallthrough
CT: control target
= control target key end

     0   :  { %s1195_s0 = inlined_call_operand.hbm [shape: f32[2,16,256], index: 0, kind: input, shape index: {}]   ;;  %s1196_s1 = inlined_call_operand.hbm [shape: f32[2,16,256], index: 1, kind: input, shape index: {}]   ;;  %s1197_s2 = inlined_call_operand.<no memory space> [shape: f32[1], index: 2, kind: input, shape index: {}]   ;;  %s1198_s3 = inlined_call_operand.vmem [shape: f32[16,2], index: 3, kind: input, shape index: {}]   ;;  %s1199_s4 = inlined_call_operand.vmem [shape: f32[1,2], index: 4, kind: input, shape index: {}]   ;;  %s1200_s5 = inlined_call_operand.vmem [shape: f32[2,32], index: 5, kind: input, shape index: {}]   ;;  %s1201_s6 = inlined_call_operand.vmem [shape: f32[1,32], index: 6, kind: input, shape index: {}]   ;;  %s1202_s7 = inlined_call_operand.hbm [shape: f32[2,1,32], index: 7, kind: output, shape index: {}]  }
   0x1   :  { %1206 = sst [smem:[#allocation16_spill]] %s1195_s0 }
   0x2   :  { %12 = sst [smem:[#allocation3]] %s1197_s2 }
   0x3   :  { %13 = vsyncpa [#allocation5], 0 }
   0x4   :  { %15 = vsyncpa [#allocation5 + $0x1], 0 }
   0x5   :  { %16 = vsyncpa [#allocation8], 0 }
   0x6   :  { %18 = vsyncpa [#allocation8 + $0x1], 0 }
   0x7   :  { %19 = vsyncpa [#allocation6], 0 }
   0x8   :  { %21 = vsyncpa [#allocation6 + $0x1], 0  ;;  %s1006_s26 = smov 0   ;;  %s1008_s27 = smov 0  }
   0x9   :  { %s1010_s28 = smov 0   ;;  %s1012_s29 = smov 0  }
   0xa   :  { %s1014_s30 = smov 0   ;;  %s1016_s8 = smov 0  }
   0xb LB: > { %1207 = sst [smem:[#allocation13_spill]] %s942_s28  ;;  %s700_s2 = sadd.s32 4294967295, %s954_s8   ;;  %s954_s8 = sphi %s1016_s8, %s27_s8   ;;  %s950_s30 = sphi %s1014_s30, %s1224_s30   ;;  %s946_s29 = sphi %s1012_s29, %s1223_s29   ;;  %s942_s28 = sphi %s1010_s28, %s1219_s28   ;;  %s938_s27 = sphi %s1008_s27, %s1222_s27   ;;  %s934_s26 = sphi %s1006_s26, %s1221_s26  }
   0xc   : > { %s701_s9 = sadd.s32 4294967294, %s954_s8   ;;  %s39_s10 = sadd.s32 1, %s950_s30 }
   0xd   : > { %s48_s11 = sadd.s32 1, %s942_s28  ;;  %p41_p0 = scmp.ge.s32.totalorder %s39_s10, 2 }
   0xe   : > { %p55_p1 = scmp.ne.s32.totalorder %s942_s28, %s938_s27  ;;  %p56_p2 = scmp.eq.s32.totalorder %s954_s8, 0 }
   0xf   : > { %p61_p3 = scmp.ne.s32.totalorder %s938_s27, %s934_s26  ;;  %s1226_s10 = smov (%p41_p0, %s39_s10), 0 }
  0x10   : > { %1208 = sst [smem:[#allocation14_spill]] %s1226_s10  ;;  %p1047_p4 = por %p56_p2, %p55_p1 }
  0x11   : > { %p62_p5 = scmp.eq.s32.totalorder %s700_s2, 0  ;;  %s43_s13 = ssub.s32 %s950_s30, %s1226_s10 }
  0x12   : > { %p218_p6 = scmp.eq.s32.totalorder %s700_s2, 1  ;;  %p46_p7 = scmp.eq.s32.totalorder %s43_s13, 0 }
  0x13   : > { %p1053_p8 = por %p62_p5, %p61_p3  ;;  %p224_p10 = scmp.eq.s32.totalorder %s701_s9, 1 }
  0x14   : > { %p1057_p9 = por %p218_p6, %p55_p1  ;;  %p703_p12 = scmp.ge.s32.totalorder %s954_s8, 2 }
  0x15   : > { %s1062_s16 = scalar_select %p46_p7, %s942_s28, %s48_s11  }
  0x16   : > { %p1064_p11 = por %p224_p10, %p61_p3  ;;  %p756_p13 = scmp.lt.s32.totalorder %s954_s8, 2 }
  0x17   : > { %1212 = sst [smem:[#allocation15_spill]] %s1062_s16  ;;  %s1071_s18 = sand.u32 1, %s942_s28  }
  0x18   : > { %s1203_s19 = sshll.u32 %s1071_s18, 5  ;;  %s720_s20 = sshll.u32 %s950_s30, 9 }
  0x19   : > { %s1214_s0 = sld [smem:[#allocation16_spill]]  ;;  %s263_s24 = scalar_lea.vmem [#allocation4], %s1203_s19 }
  0x1a   : > { %s272_s25 = sshll.u32 %s263_s24, 4  ;;  %p1084_p0 = pnand %p756_p13, %p1047_p4  ;;  %s273_s25 = int_to_ptr.vmem [resolvable:$true] %s272_s25 }
  0x1b   : > { %p710_p1 = scmp.ge.s32.totalorder %s954_s8, 1  ;;  %s260_s9 = scalar_lea.sflag [#allocation5], %s1071_s18 }
  0x1c   : > { %p816_p2 = pneg %p1084_p0  ;;  %s827_s11 = scalar_lea.vmem %s273_s25, 512 }
  0x1d   : > { %p828_p3 = scmp.ne.s32.totalorder %s273_s25, %s827_s11  ;;  %s956_s13 = smov [#allocation4]  }
  0x1e   : > { %s832_s21 = sshll.u32 %s956_s13, 4  ;;  %s833_s21 = int_to_ptr.vmem [resolvable:$false] %s832_s21 }
  0x1f   : > { %s271_s23 = scalar_lea.hbm %s1214_s0, %s720_s20  ;;  %p830_p5 = pnand %p828_p3, %p816_p2 }
  0x20   : > { %s834_s12 = scalar_lea.vmem %s833_s21, 1024  ;;  %p835_p4 = scmp.lt.s32.totalorder %s273_s25, %s833_s21 }
  0x21   : > { %p831_p6 = pneg %p830_p5  ;;  %p836_p7 = scmp.lt.s32.totalorder %s834_s12, %s827_s11 }
  0x23   : > { %p837_p10 = por %p836_p7, %p835_p4 }
  0x25   : > { %p838_p13 = pnand %p837_p10, %p831_p6 }
  0x27   : > { %841 = shalt.err (!%p838_p13)
}
  0x28   : > { %s957_s22 = smov 256   ;;  %s958_s24 = smov 16  }
  0x29   : > { %748 = dma.hbm_to_vmem [thread:$0]  (!%p1084_p0), %s271_s23, 512, %s273_s25, %s260_s9, %s957_s22, %s957_s22, %s958_s24  }
  0x2a   : > { %p303_p3 = scmp.lt.s32.totalorder %s954_s8, 3  ;;  %s294_s11 = scalar_lea.hbm %s1196_s1, %s720_s20 }
  0x2b   : > { %s1217_s12 = sshll.u32 %s1071_s18, 5  ;;  %s283_s16 = scalar_lea.sflag [#allocation8], %s1071_s18 }
  0x2c   : > { %p1105_p5 = pnand %p710_p1, %p303_p3  ;;  %s286_s0 = scalar_lea.vmem [#allocation7], %s1217_s12 }
  0x2d   : > { %s295_s10 = sshll.u32 %s286_s0, 4  ;;  %s959_s23 = smov [#allocation7]   ;;  %s296_s10 = int_to_ptr.vmem [resolvable:$true] %s295_s10 }
  0x2e   : > { %s855_s28 = scalar_lea.vmem %s296_s10, 512  ;;  %s860_s25 = sshll.u32 %s959_s23, 4  ;;  %s861_s25 = int_to_ptr.vmem [resolvable:$false] %s860_s25 }
  0x2f   : > { %p856_p6 = scmp.ne.s32.totalorder %s296_s10, %s855_s28  ;;  %s862_s19 = scalar_lea.vmem %s861_s25, 1024 }
  0x30   : > { %p863_p10 = scmp.lt.s32.totalorder %s296_s10, %s861_s25  ;;  %p864_p1 = scmp.lt.s32.totalorder %s862_s19, %s855_s28 }
  0x31   : > { %p858_p4 = pnand %p856_p6, %p816_p2 }
  0x32   : > { %p865_p13 = por %p864_p1, %p863_p10 }
  0x33   : > { %p859_p7 = pneg %p858_p4 }
  0x35   : > { %p866_p3 = pnand %p865_p13, %p859_p7 }
  0x37   : > { %869 = shalt.err (!%p866_p3)
}
  0x38   : > { %751 = dma.hbm_to_vmem [thread:$0]  (!%p1084_p0), %s294_s11, 512, %s296_s10, %s283_s16, %s957_s22, %s957_s22, %s958_s24  }
  0x39   : > { %307 = sbr.rel (%p1105_p5) target bundleno = 656 (0x290), region = 48  ;;  %s1120_s0 = sand.u32 (!%p1105_p5), 1, %s938_s27  }
  0x3a   : > { %s711_s18 = sshll.u32 (!%p1105_p5), %s1120_s0, 5  ;;  %s310_s20 = scalar_lea.sflag (!%p1105_p5), [#allocation5], %s1120_s0 }
  0x3b   : > { %s313_s9 = scalar_lea.vmem (!%p1105_p5), [#allocation4], %s711_s18 }
  0x3e   : > { %921 = dma.done.wait (%p1053_p8), %s310_s20, 512  }
  0x3f   : > { %923 = vsyncadd (%p1053_p8), %s310_s20, 4294966784  ;;  %s319_s28 = scalar_lea.sflag [#allocation8], %s1120_s0  ;;  %s322_s10 = scalar_lea.vmem [#allocation7], %s711_s18 }
  0x40   : > { %925 = dma.done.wait (%p1053_p8), %s319_s28, 512  }
  0x41   : > { %927 = vsyncadd (%p1053_p8), %s319_s28, 4294966784  ;;  %v365_v0 = vld [vmem:[%s313_s9] sm:$0xff]  ;;  %v377_v2 = vld [vmem:[%s313_s9 + $0x8] sm:$0xff]  ;;  %v960_v14 = vmov 0.0   ;;  %vm961_vm0 = vmmov 0   ;;  %v405_v17 = vlaneseq  ;;  %vm416_vm1 = vcmask 130112  }
  0x42   : > { %v367_v1 = vld [vmem:[%s322_s10] sm:$0xff]  ;;  %v379_v4 = vld [vmem:[%s322_s10 + $0x8] sm:$0xff]  ;;  %v366_v5 = vld [vmem:[%s313_s9 + $0x10] sm:$0xff]  ;;  %727 = vmatprep.subr.mxu0 %v960_v14  ;;  %734 = vmatprep.subr.mxu1 %v960_v14  ;;  %vm418_vm2 = vcmask 130048   ;;  %vm502_vm3 = vcmask 1041408   ;;  %s491_s11 = sld [smem:[#allocation3]] }
  0x43   : > { %v369_v3 = vadd.f32 %v367_v1, %v365_v0  ;;  %v368_v6 = vld [vmem:[%s322_s10 + $0x10] sm:$0xff]  ;;  %v381_v7 = vadd.f32 %v379_v4, %v377_v2  ;;  %v378_v9 = vld [vmem:[%s313_s9 + $0x18] sm:$0xff]  ;;  %v401_v15 = vld [vmem:[%s1198_s3 + $0x8] sm:$0xff]  ;;  %731 = vmatprep.mubr.msk.f32.mxu0 %vm961_vm0, %v960_v14  ;;  %736 = vmatprep.mubr.msk.f32.mxu1 %vm961_vm0, %v960_v14  ;;  %v406_v18 = vand.u32 127, %v405_v17  ;;  %v408_v19 = vshrl.u32 %v405_v17, 7  ;;  %s717_s19 = sshll.u32 %s946_s29, 4 }
  0x44   : > { %v370_v8 = vadd.f32 %v368_v6, %v366_v5  ;;  %v380_v10 = vld [vmem:[%s322_s10 + $0x18] sm:$0xff]  ;;  %728 = vmatpush3.msra.mxu0 %v401_v15  ;;  %v400_v16 = vld [vmem:[%s1198_s3] sm:$0xff]  ;;  %vm498_vm5 = vcmask 15360   ;;  %s356_s18 = scalar_lea.vmem [#allocation9], %s1120_s0  ;;  %vm582_vm6 = vcmask 253952   ;;  %s1153_s10 = scalar_lea.hbm %s1202_s7, %s717_s19 }
  0x45   : > { %v382_v11 = vadd.f32 %v380_v10, %v378_v9  ;;  %v385_v12 = vadd.f32 %v381_v7, %v369_v3  ;;  %729 = vmatprep.subr.mxu0 %v960_v14  ;;  %v411_v20 = vadd.s32 4294967288, %v406_v18  ;;  %v409_v22 = vsub.s32 %v406_v18, %v408_v19  ;;  %v496_v30 = vld [vmem:[%s1200_s5] sm:$0x3]  ;;  %s597_s20 = sshll.u32 %s356_s18, 4  ;;  %s585_s14 = scalar_lea.sflag [#allocation6], %s1120_s0  ;;  %s598_s20 = int_to_ptr.vmem [resolvable:$true] %s597_s20 }
  0x46   : > { %730 = vmatpush3.msra.mxu0 %v400_v16  ;;  %735 = vmatpush3.msk.msra.mxu1 %vm502_vm3, %v496_v30  ;;  %v402_v31 = vld [vmem:[%s1199_s4] sm:$0x1]  ;;  %s870_s16 = scalar_lea.vmem %s598_s20, 16  ;;  %s962_s2 = smov [#allocation9]  }
  0x47   : > { %394 = vadd.xlane.f32.xlu0 %v385_v12  ;;  %v386_v13 = vadd.f32 %v382_v11, %v370_v8  ;;  %v414_v24 = vsub.s32 %v411_v20, %v408_v19  ;;  %v497_v38 = vld [vmem:[%s1201_s6] sm:$0x1]  ;;  %p871_p8 = scmp.ne.s32.totalorder %s598_s20, %s870_s16  ;;  %s874_s22 = sshll.u32 %s962_s2, 4  ;;  %s875_s22 = int_to_ptr.vmem [resolvable:$false] %s874_s22 }
  0x48   : > { %v493_v33 = vstv %s491_s11  ;;  %s876_s29 = scalar_lea.vmem %s875_s22, 32  ;;  %p877_p5 = scmp.lt.s32.totalorder %s598_s20, %s875_s22 }
  0x49   : > { %p872_p0 = pnand %p871_p8, %p1057_p9  ;;  %p878_p6 = scmp.lt.s32.totalorder %s876_s29, %s870_s16 }
  0x4b   : > { %396 = vadd.xlane.f32.xlu0 %v386_v13  ;;  %p873_p2 = pneg %p872_p0  ;;  %p879_p4 = por %p878_p6, %p877_p5 }
  0x4d   : > { %p880_p7 = pnand %p879_p4, %p873_p2 }
  0xd0   : > { %v395_v21 = vpop.xlane.xlu0 %394 }
  0xd1   : > { %v398_v23 = vmul.f32 0.00390625, %v395_v21 }
  0xd3   : > { %v410_v27 = vrot.slane %v398_v23, %v409_v22 }
  0xd4   : > { %v397_v25 = vpop.xlane.xlu0 %396 }
  0xd5   : > { %v399_v26 = vmul.f32 0.00390625, %v397_v25 }
  0xd7   : > { %v415_v28 = vrot.slane %v399_v26, %v414_v24 }
  0xd9   : > { %v417_v29 = vsel %vm416_vm1, %v415_v28, %v410_v27 }
  0xda   : > { %732 = vmatmul.mubr.msk.f32.vlgmr.msra.gmra.mxu0 %vm418_vm2, %v417_v29 }
 0x19a   : > { %v487_v32 = vpop.f32.mrf.mxu0 }
 0x19b   : > { %v488_v34 = vadd.f32 %v487_v32, %v402_v31 }
 0x19c   : > { %v733_v35 = vpop.f32.mrf.mxu0 }
 0x19d   : > { %vm492_vm4 = vcmp.ge.f32.partialorder %v488_v34, 0.0  ;;  %v494_v36 = vmul.f32 %v493_v33, %v488_v34 }
 0x19f   : > { %v495_v37 = vsel %vm492_vm4, %v488_v34, %v494_v36 }
 0x1a0   : > { %737 = vmatmul.mubr.msk.f32.vlgmr.msra.gmra.mxu1 %vm498_vm5, %v495_v37 }
 0x260   : > { %v572_v39 = vpop.f32.mrf.mxu1 }
 0x261   : > { %v573_v40 = vadd.f32 %v572_v39, %v497_v38 }
 0x262   : > { %v738_v41 = vpop.f32.mrf.mxu1 }
 0x263   : > { %v716_v42 = vmul.f32 -1.442695, %v573_v40 }
 0x265   : > { %810 = vpow2.f32 %v716_v42 }
 0x272   : > { %v811_v43 = vpop.eup %810 }
 0x273   : > { %v579_v44 = vadd.f32 1.0, %v811_v43 }
 0x275   : > { %812 = vrcp.f32 %v579_v44 }
 0x282   : > { %v813_v45 = vpop.eup %812 }
 0x283   : > { %583 = vst.msk [vmem:[%s356_s18] sm:$0x1] %vm582_vm6, %v813_v45 }
 0x284   : > { %883 = shalt.err (!%p880_p7)
}
 0x285   : > { %s884_s24 = scalar_lea.hbm %s1153_s10, 16  ;;  %s888_s11 = scalar_lea.hbm %s1202_s7, 32 }
 0x286   : > { %p885_p10 = scmp.ne.s32.totalorder %s1153_s10, %s884_s24  ;;  %p889_p3 = scmp.lt.s32.totalorder %s1153_s10, %s1202_s7 }
 0x287   : > { %p890_p8 = scmp.lt.s32.totalorder %s888_s11, %s884_s24 }
 0x288   : > { %p886_p1 = pnand %p885_p10, %p1057_p9 }
 0x289   : > { %p891_p0 = por %p890_p8, %p889_p3 }
 0x28a   : > { %p887_p13 = pneg %p886_p1 }
 0x28c   : > { %p892_p2 = pnand %p891_p0, %p887_p13 }
 0x28e   : > { %895 = shalt.err (!%p892_p2)
}
 0x28f   : > { %743 = dma.vmem_to_hbm [thread:$0]  (%p1057_p9), %s598_s20, 16, %s1153_s10, %s585_s14  }
 0x290 PF: > { %s609_s23 = sand.u32 1, %s934_s26   ;;  %p753_p5 = pnand %p703_p12, %p1064_p11 }
 0x291   : > { %s610_s25 = scalar_lea.sflag [#allocation6], %s609_s23 }
 0x292   : > { %p754_p6 = pneg %p753_p5 }
 0x294   : > { %929 = dma.done.wait (%p754_p6), %s610_s25, 16  }
 0x295   : > { %931 = vsyncadd (%p754_p6), %s610_s25, 4294967280  ;;  %s27_s8 = sadd.s32 1, %s954_s8   ;;  %s1218_s19 = sld [smem:[#allocation13_spill]] }
 0x296   : > { %p24_p4 = scmp.ge.s32.totalorder %s27_s8, 4   ;;  %s1219_s28 = sld [smem:[#allocation15_spill]] }
 0x297   : > { %s1220_s15 = sld [smem:[#allocation14_spill]]  ;;  %s1221_s26 = smov %s938_s27 }
 0x298   : > { %s1223_s29 = smov %s950_s30 }
 0x299   :  { %26 = sbr.rel (!%p24_p4) target bundleno = 11 (0xb), region = 114 }
 0x29b   : > { %s1222_s27 = smov %s1218_s19 }
 0x29d   : > { %s1224_s30 = smov %s1220_s15 }
 0x29e   :  { %614 = vsyncpa [#allocation5], 1 }
 0x29f   :  { %616 = vsyncpa [#allocation5 + $0x1], 1 }
 0x2a0   :  { %617 = vsyncpa [#allocation8], 1 }
 0x2a1   :  { %619 = vsyncpa [#allocation8 + $0x1], 1 }
 0x2a2   :  { %620 = vsyncpa [#allocation6], 1 }
 0x2a3   :  { %622 = vsyncpa [#allocation6 + $0x1], 1 }

</bundles_post_ra>
